<compile_context>
chip_gen: v5e
topology: v5e:2x2
jax: 0.10.0
libtpu: 0.0.40
codegen_flags: <defaults>
</compile_context>

<pallas_src>
import jax
import jax.numpy as jnp
from jax.experimental import pallas as pl
from jax.experimental.pallas import tpu as pltpu


def upadd_kernel(cx_ref, px_ref, w_ref, b_ref, o_ref):
    # cx_ref: (1, TH, W, Cin)        high-res tile (1x1 conv input)
    # px_ref: (1, TH//2, W//2, Cout) low-res tile (nearest-upsampled 2x)
    # w_ref : (Cin, Cout)            1x1 conv weight as a matmul matrix
    # b_ref : (1, Cout)
    # o_ref : (1, TH, W, Cout)
    _, TH, W, Cin = cx_ref.shape
    _, hh, wh, Cout = px_ref.shape

    # 1x1 conv == per-pixel matmul over channels on the MXU. The reshape only
    # merges leading (non-lane) dims, so it is layout preserving.
    cx = cx_ref[...].reshape(TH * W, Cin)
    y = jnp.dot(cx, w_ref[...], preferred_element_type=jnp.float32)
    y = y + b_ref[...]  # (1, Cout) bias, sublane-broadcast over pixels

    # Nearest-neighbor 2x upsample + add as a broadcast add: view the conv
    # result as (hh, 2, wh, 2, Cout) and add px once per 2x2 cell. This stays
    # on the VPU and avoids the extra (TH, W, Cout) temporary that a
    # jnp.repeat-based upsample would materialize. Math stays in f32 until the
    # final store (important for bf16 inputs on v5e).
    px = px_ref[0].astype(jnp.float32)  # (hh, wh, Cout)
    out = y.reshape(hh, 2, wh, 2, Cout) + px[:, None, :, None, :]

    o_ref[...] = out.reshape(1, TH, W, Cout).astype(o_ref.dtype)


def _choose_tile_h(H, W, Cin, Cout, itemsize, tile_budget_bytes):
    """Largest even TH dividing H whose double-buffered working set fits."""
    best = 2
    for th in range(2, H + 1, 2):
        if H % th:
            continue
        cx_b = th * W * Cin * itemsize
        px_b = (th // 2) * (W // 2) * Cout * itemsize
        out_b = th * W * Cout * itemsize
        if 2 * (cx_b + px_b + out_b) <= tile_budget_bytes:  # x2: double buffer
            best = th
    return best


def upadd_nhwc(cx_nhwc, px_nhwc, w, b):
    """cx_nhwc: (N,H,W,Cin), px_nhwc: (N,H/2,W/2,Cout), w: (Cin,Cout), b: (Cout,)."""
    N, H, W, Cin = cx_nhwc.shape
    Np, Hh, Wh, Cout = px_nhwc.shape
    assert N == Np, "batch mismatch"
    assert Hh * 2 == H and Wh * 2 == W, "px must be the 2x-downsampled size of cx"
    assert w.shape == (Cin, Cout) and b.shape == (Cout,)

    # Per-generation VMEM budget: v5e/v6e have 128 MiB, v7x only 64 MiB.
    try:
        vmem_cap = int(pltpu.get_tpu_info().vmem_capacity_bytes)
    except Exception:
        vmem_cap = 64 << 20  # conservative default == v7x per-core VMEM
    vmem_limit = min((vmem_cap * 3) // 4, 100 << 20)  # 48 MiB on v7x, ~96 MiB on v5e/v6e
    itemsize = jnp.dtype(cx_nhwc.dtype).itemsize
    TH = _choose_tile_h(H, W, Cin, Cout, itemsize, int(vmem_limit * 0.8))
    n_ht = H // TH

    b2d = b.reshape(1, Cout)

    return pl.pallas_call(
        upadd_kernel,
        out_shape=jax.ShapeDtypeStruct((N, H, W, Cout), cx_nhwc.dtype),
        grid_spec=pltpu.PrefetchScalarGridSpec(
            num_scalar_prefetch=0,
            grid=(N, n_ht),  # both axes independent -> more parallel steps
            in_specs=[
                pl.BlockSpec((1, TH, W, Cin), lambda n, h: (n, h, 0, 0)),
                pl.BlockSpec((1, TH // 2, Wh, Cout), lambda n, h: (n, h, 0, 0)),
                pl.BlockSpec((Cin, Cout), lambda n, h: (0, 0)),
                pl.BlockSpec((1, Cout), lambda n, h: (0, 0)),
            ],
            out_specs=pl.BlockSpec((1, TH, W, Cout), lambda n, h: (n, h, 0, 0)),
        ),
        compiler_params=pltpu.CompilerParams(
            dimension_semantics=("parallel", "parallel"),
            vmem_limit_bytes=int(vmem_limit),
        ),
    )(cx_nhwc, px_nhwc, w, b2d)


def upadd_nchw(cx, px, w, b):
    """Matches UpAdd.forward: cx (N,Cin,H,W), px (N,Cout,H/2,W/2) -> (N,Cout,H,W).

    NOTE: the NCHW<->NHWC transposes are XLA HBM round trips; prefer keeping
    the surrounding model NHWC and calling upadd_nhwc directly.
    """
    cx_nhwc = jnp.transpose(cx, (0, 2, 3, 1))
    px_nhwc = jnp.transpose(px, (0, 2, 3, 1))
    out_nhwc = upadd_nhwc(cx_nhwc, px_nhwc, w, b)
    return jnp.transpose(out_nhwc, (0, 3, 1, 2))


if __name__ == "__main__":
    # Module config (small synthetic shapes).
    N, Cin, Cout = 2, 4, 8
    H = W = 16

    key = jax.random.PRNGKey(0)
    k1, k2, k3, k4 = jax.random.split(key, 4)

    # Inputs (PyTorch NCHW convention).
    cx = jax.random.normal(k1, (N, Cin, H, W), dtype=jnp.float32)
    px = jax.random.normal(k2, (N, Cout, H // 2, W // 2), dtype=jnp.float32)

    # Deterministic parameter init. PyTorch conv weight is (Cout, Cin, 1, 1);
    # we store it as a (Cin, Cout) matmul matrix for the 1x1 conv.
    w = 0.1 * jax.random.normal(k3, (Cin, Cout), dtype=jnp.float32)
    b = 0.1 * jax.random.normal(k4, (Cout,), dtype=jnp.float32)

    out = upadd_nchw(cx, px, w, b)
    out = jax.block_until_ready(out)

    # Pure-JAX reference check.
    cx_nhwc = jnp.transpose(cx, (0, 2, 3, 1))
    ref_conv = jnp.einsum("nhwc,cd->nhwd", cx_nhwc, w) + b
    px_nhwc = jnp.transpose(px, (0, 2, 3, 1))
    ref_up = jnp.repeat(jnp.repeat(px_nhwc, 2, axis=1), 2, axis=2)
    ref = jnp.transpose(ref_conv + ref_up, (0, 3, 1, 2))
    assert jnp.allclose(out, ref, atol=1e-5, rtol=1e-5), "mismatch vs reference"

    assert out.shape == (N, Cout, H, W)
    print("KERNEL_OK")
</pallas_src>

<mosaic_0001>
module attributes {stable_mosaic.version = 11 : i64} {
  func.func @upadd_kernel(%arg0: i32, %arg1: i32, %arg2: memref<1x16x16x4xf32, #tpu.memory_space<vmem>>, %arg3: memref<1x8x8x8xf32, #tpu.memory_space<vmem>>, %arg4: memref<4x8xf32, #tpu.memory_space<vmem>>, %arg5: memref<1x8xf32, #tpu.memory_space<vmem>>, %arg6: memref<1x16x16x8xf32, #tpu.memory_space<vmem>>) attributes {dimension_semantics = [#tpu.dimension_semantics<parallel>, #tpu.dimension_semantics<parallel>], iteration_bounds = array<i64: 2, 1>, scalar_prefetch = 0 : i64, scratch_operands = 0 : i64, tpu.core_type = #tpu.core_type<tc>, window_params = [{transform_indices = @transform_0, window_bounds = array<i64: 1, 16, 16, 4>}, {transform_indices = @transform_1, window_bounds = array<i64: 1, 8, 8, 8>}, {pipeline_mode = #tpu.pipeline_mode<synchronous>, transform_indices = @transform_2, window_bounds = array<i64: 4, 8>}, {pipeline_mode = #tpu.pipeline_mode<synchronous>, transform_indices = @transform_3, window_bounds = array<i64: 1, 8>}, {transform_indices = @transform_4, window_bounds = array<i64: 1, 16, 16, 8>}]} {
    %c0 = arith.constant 0 : index
    %c0_0 = arith.constant 0 : index
    %c0_1 = arith.constant 0 : index
    %c0_2 = arith.constant 0 : index
    %0 = vector.load %arg2[%c0, %c0_0, %c0_1, %c0_2] : memref<1x16x16x4xf32, #tpu.memory_space<vmem>>, vector<1x16x16x4xf32>
    %1 = vector.shape_cast %0 : vector<1x16x16x4xf32> to vector<256x4xf32>
    %c0_3 = arith.constant 0 : index
    %c0_4 = arith.constant 0 : index
    %2 = vector.load %arg4[%c0_3, %c0_4] : memref<4x8xf32, #tpu.memory_space<vmem>>, vector<4x8xf32>
    %cst = arith.constant dense<0.000000e+00> : vector<256x8xf32>
    %3 = tpu.matmul %1, %2, %cst {dimension_numbers = #tpu.dot_dimension_numbers<[1], [0], [0], [1], [0, 0, 1, 1], [], []>} : vector<256x4xf32>, vector<4x8xf32>, vector<256x8xf32> -> vector<256x8xf32>
    %c0_5 = arith.constant 0 : index
    %c0_6 = arith.constant 0 : index
    %4 = vector.load %arg5[%c0_5, %c0_6] : memref<1x8xf32, #tpu.memory_space<vmem>>, vector<1x8xf32>
    %5 = vector.broadcast %4 : vector<1x8xf32> to vector<256x8xf32>
    %6 = arith.addf %3, %5 : vector<256x8xf32>
    %c0_7 = arith.constant 0 : index
    %c0_8 = arith.constant 0 : index
    %c0_9 = arith.constant 0 : index
    %c0_10 = arith.constant 0 : index
    %7 = vector.load %arg3[%c0_7, %c0_8, %c0_9, %c0_10] : memref<1x8x8x8xf32, #tpu.memory_space<vmem>>, vector<1x8x8x8xf32>
    %8 = vector.shape_cast %7 : vector<1x8x8x8xf32> to vector<8x8x8xf32>
    %9 = vector.shape_cast %6 : vector<256x8xf32> to vector<8x2x8x2x8xf32>
    %10 = vector.shape_cast %8 : vector<8x8x8xf32> to vector<8x1x8x1x8xf32>
    %11 = vector.broadcast %10 : vector<8x1x8x1x8xf32> to vector<8x2x8x2x8xf32>
    %12 = arith.addf %9, %11 : vector<8x2x8x2x8xf32>
    %13 = vector.shape_cast %12 : vector<8x2x8x2x8xf32> to vector<1x16x16x8xf32>
    %c0_11 = arith.constant 0 : index
    %c0_12 = arith.constant 0 : index
    %c0_13 = arith.constant 0 : index
    %c0_14 = arith.constant 0 : index
    %14 = vector.load %arg6[%c0_11, %c0_12, %c0_13, %c0_14] : memref<1x16x16x8xf32, #tpu.memory_space<vmem>>, vector<1x16x16x8xf32>
    tpu.vector_store %arg6[%c0_11, %c0_12, %c0_13, %c0_14], %13 {strides = array<i32>} : memref<1x16x16x8xf32, #tpu.memory_space<vmem>>, vector<1x16x16x8xf32>,
    return
  }
  func.func @transform_0(%arg0: i32, %arg1: i32) -> (i32, i32, i32, i32) {
    %c0_i32 = arith.constant 0 : i32
    %c0_i32_0 = arith.constant 0 : i32
    %c0_i32_1 = arith.constant 0 : i32
    return %arg0, %arg1, %c0_i32, %c0_i32_0 : i32, i32, i32, i32
  }
  func.func @transform_1(%arg0: i32, %arg1: i32) -> (i32, i32, i32, i32) {
    %c0_i32 = arith.constant 0 : i32
    %c0_i32_0 = arith.constant 0 : i32
    %c0_i32_1 = arith.constant 0 : i32
    return %arg0, %arg1, %c0_i32, %c0_i32_0 : i32, i32, i32, i32
  }
  func.func @transform_2(%arg0: i32, %arg1: i32) -> (i32, i32) {
    %c0_i32 = arith.constant 0 : i32
    %c0_i32_0 = arith.constant 0 : i32
    %c0_i32_1 = arith.constant 0 : i32
    return %c0_i32, %c0_i32_0 : i32, i32
  }
  func.func @transform_3(%arg0: i32, %arg1: i32) -> (i32, i32) {
    %c0_i32 = arith.constant 0 : i32
    %c0_i32_0 = arith.constant 0 : i32
    %c0_i32_1 = arith.constant 0 : i32
    return %c0_i32, %c0_i32_0 : i32, i32
  }
  func.func @transform_4(%arg0: i32, %arg1: i32) -> (i32, i32, i32, i32) {
    %c0_i32 = arith.constant 0 : i32
    %c0_i32_0 = arith.constant 0 : i32
    %c0_i32_1 = arith.constant 0 : i32
    return %arg0, %arg1, %c0_i32, %c0_i32_0 : i32, i32, i32, i32
  }
}

</mosaic_0001>

<bundles_post_ra>
// kernel: tpu_custom_call.1
= control target key start
LH: loop header
LB: loop body
LE: loop exit
PB: predicated region body
PF: predicated region fallthrough
CT: control target
= control target key end

     0   :  { %s1682_s15 = smov 0   ;;  %s1684_s16 = smov 0   ;;  %s2009_s0 = inlined_call_operand.vmem [shape: f32[2,16,16,4], index: 0, kind: input, shape index: {}]   ;;  %s2010_s1 = inlined_call_operand.vmem [shape: f32[2,8,8,8], index: 1, kind: input, shape index: {}]   ;;  %s2011_s2 = inlined_call_operand.vmem [shape: f32[4,8], index: 2, kind: input, shape index: {}]   ;;  %s2012_s3 = inlined_call_operand.vmem [shape: f32[1,8], index: 3, kind: input, shape index: {}]   ;;  %s2013_s4 = inlined_call_operand.vmem [shape: f32[2,16,16,8], index: 4, kind: output, shape index: {}]  }
   0x1   :  { %s1686_s17 = smov 0  }
   0x2 LB: > { %s26_s18 = sadd.s32 1, %s1651_s16  ;;  %p1559_p0 = scmp.ge.s32.totalorder %s1655_s17, 1  ;;  %s1655_s17 = sphi %s1686_s17, %s14_s17   ;;  %s1651_s16 = sphi %s1684_s16, %s2015_s16   ;;  %s1647_s15 = sphi %s1682_s15, %s2014_s15  }
   0x3   : > { %p28_p1 = scmp.ge.s32.totalorder %s26_s18, 2  ;;  %p201_p2 = scmp.lt.s32.totalorder %s1655_s17, 3 }
   0x5   : > { %s2017_s18 = smov (%p28_p1, %s26_s18), 0  ;;  %p202_p3 = pnand %p1559_p0, %p201_p2 }
   0x6   : > { %p247_p4 = scmp.lt.s32.totalorder (!%p202_p3), %s1647_s15, 1 }
   0x7   : > { %205 = sbr.rel (%p202_p3) target bundleno = 378 (0x17a), region = 36 }
   0xc   : > { %v310_v0 = vld [vmem:[%s2011_s2] sm:$0xf]  ;;  %vm412_vm0 = vcmask 1043456   ;;  %s2019_s15 = smov (!%p247_p4, %s1647_s15), 1  ;;  %vm315_vm1 = vcmask 31744   ;;  %vm1408_vm2 = vcmask 64512  }
   0xd   : > { %1566 = vmatpush.msk.msra.mxu0 %vm412_vm0, %v310_v0  ;;  %1604 = vmatpush.msk.msra.mxu1 %vm412_vm0, %v310_v0  ;;  %s1601_s21 = sshll.u32 %s2019_s15, 8  ;;  %s1602_s25 = sshll.u32 %s2019_s15, 6  ;;  %v1787_v34 = vld [vmem:[%s2012_s3] ss:$0 sm:$0xff] }
   0xe   : > { %1605 = vmatpush.msk.msra.mxu2 %vm412_vm0, %v310_v0  ;;  %1606 = vmatpush.msk.msra.mxu3 %vm412_vm0, %v310_v0  ;;  %s1711_s24 = scalar_lea.vmem %s2009_s0, %s1601_s21  ;;  %s1780_s28 = scalar_lea.vmem %s2010_s1, %s1602_s25 }
   0xf   : > { %v278_v1 = vld [vmem:[%s1711_s24] sm:$0xff]  ;;  %v279_v3 = vld [vmem:[%s1711_s24 + $0x8] sm:$0xff]  ;;  %v280_v5 = vld [vmem:[%s1711_s24 + $0x10] sm:$0xff]  ;;  %s1796_s7 = scalar_lea.vmem %s2013_s4, %s1601_s21 }
  0x10   : > { %1567 = vmatmul.msk.f32.vlgmr.msra.gmra.mxu0 %vm315_vm1, %v278_v1  ;;  %v286_v2 = vld [vmem:[%s1711_s24 + $0x40] sm:$0xff]  ;;  %v287_v4 = vld [vmem:[%s1711_s24 + $0x48] sm:$0xff]  ;;  %v288_v6 = vld [vmem:[%s1711_s24 + $0x50] sm:$0xff] }
  0x11   : > { %1575 = vmatmul.msk.f32.vlgmr.msra.gmra.mxu1 %vm315_vm1, %v286_v2  ;;  %v281_v7 = vld [vmem:[%s1711_s24 + $0x18] sm:$0xff]  ;;  %v294_v9 = vld [vmem:[%s1711_s24 + $0x80] sm:$0xff]  ;;  %v295_v13 = vld [vmem:[%s1711_s24 + $0x88] sm:$0xff] }
  0x12   : > { %v289_v8 = vld [vmem:[%s1711_s24 + $0x58] sm:$0xff]  ;;  %1583 = vmatmul.msk.f32.vlgmr.msra.gmra.mxu2 %vm315_vm1, %v294_v9  ;;  %v302_v10 = vld [vmem:[%s1711_s24 + $0xc0] sm:$0xff]  ;;  %v303_v14 = vld [vmem:[%s1711_s24 + $0xc8] sm:$0xff] }
  0x13   : > { %1591 = vmatmul.msk.f32.vlgmr.msra.gmra.mxu3 %vm315_vm1, %v302_v10  ;;  %v282_v11 = vld [vmem:[%s1711_s24 + $0x20] sm:$0xff]  ;;  %v283_v15 = vld [vmem:[%s1711_s24 + $0x28] sm:$0xff]  ;;  %v296_v17 = vld [vmem:[%s1711_s24 + $0x90] sm:$0xff] }
  0x14   : > { %v290_v12 = vld [vmem:[%s1711_s24 + $0x60] sm:$0xff]  ;;  %v291_v16 = vld [vmem:[%s1711_s24 + $0x68] sm:$0xff]  ;;  %v304_v18 = vld [vmem:[%s1711_s24 + $0xd0] sm:$0xff] }
  0x15   : > { %v284_v19 = vld [vmem:[%s1711_s24 + $0x30] sm:$0xff]  ;;  %v297_v21 = vld [vmem:[%s1711_s24 + $0x98] sm:$0xff]  ;;  %v298_v25 = vld [vmem:[%s1711_s24 + $0xa0] sm:$0xff] }
  0x16   : > { %v292_v20 = vld [vmem:[%s1711_s24 + $0x70] sm:$0xff]  ;;  %v305_v22 = vld [vmem:[%s1711_s24 + $0xd8] sm:$0xff]  ;;  %v306_v26 = vld [vmem:[%s1711_s24 + $0xe0] sm:$0xff] }
  0x17   : > { %v285_v23 = vld [vmem:[%s1711_s24 + $0x38] sm:$0xff]  ;;  %v299_v27 = vld [vmem:[%s1711_s24 + $0xa8] sm:$0xff]  ;;  %v300_v28 = vld [vmem:[%s1711_s24 + $0xb0] sm:$0xff] }
  0x18   : > { %1568 = vmatmul.msk.f32.gmra.mxu0 %vm315_vm1, %v279_v3  ;;  %v293_v24 = vld [vmem:[%s1711_s24 + $0x78] sm:$0xff]  ;;  %v307_v30 = vld [vmem:[%s1711_s24 + $0xe8] sm:$0xff]  ;;  %v308_v31 = vld [vmem:[%s1711_s24 + $0xf0] sm:$0xff] }
  0x19   : > { %1576 = vmatmul.msk.f32.gmra.mxu1 %vm315_vm1, %v287_v4  ;;  %v301_v29 = vld [vmem:[%s1711_s24 + $0xb8] sm:$0xff]  ;;  %v529_v33 = vld [vmem:[%s1780_s28] sm:$0xff] }
  0x1a   : > { %1584 = vmatmul.msk.f32.gmra.mxu2 %vm315_vm1, %v295_v13  ;;  %v309_v32 = vld [vmem:[%s1711_s24 + $0xf8] sm:$0xff]  ;;  %v769_v35 = vrot.slane %v529_v33, 1  ;;  %v770_v36 = vrot.slane %v529_v33, 2  ;;  %v771_v37 = vrot.slane %v529_v33, 3  ;;  %v825_v38 = vperm.slane %v529_v33, 0 }
  0x1b   : > { %1592 = vmatmul.msk.f32.gmra.mxu3 %vm315_vm1, %v303_v14  ;;  %v772_v44 = vrot.slane %v529_v33, 4  ;;  %v773_v49 = vrot.slane %v529_v33, 5  ;;  %v774_v50 = vrot.slane %v529_v33, 6  ;;  %v775_v54 = vrot.slane %v529_v33, 7 }
  0x1c   : > { %v826_v41 = vperm.slane %v769_v35, 0  ;;  %v827_v42 = vperm.slane %v770_v36, 0  ;;  %v828_v43 = vperm.slane %v771_v37, 0 }
  0x1d   : > { %v829_v55 = vperm.slane %v772_v44, 0  ;;  %v830_v58 = vperm.slane %v773_v49, 0  ;;  %v831_v59 = vperm.slane %v774_v50, 0  ;;  %v832_v60 = vperm.slane %v775_v54, 0 }
  0x20   : > { %1569 = vmatmul.msk.f32.gmra.mxu0 %vm315_vm1, %v280_v5 }
  0x21   : > { %1577 = vmatmul.msk.f32.gmra.mxu1 %vm315_vm1, %v288_v6 }
  0x22   : > { %1585 = vmatmul.msk.f32.gmra.mxu2 %vm315_vm1, %v296_v17  ;;  %v1803_v17 = vld [vmem:[%s1780_s28 + $0x8] sm:$0xff] }
  0x23   : > { %1593 = vmatmul.msk.f32.gmra.mxu3 %vm315_vm1, %v304_v18  ;;  %v779_v37 = vrot.slane %v1803_v17, 4  ;;  %v781_v44 = vrot.slane %v1803_v17, 6 }
  0x25   : > { %v837_v49 = vperm.slane %v779_v37, 0  ;;  %v839_v54 = vperm.slane %v781_v44, 0 }
  0x28   : > { %1570 = vmatmul.msk.f32.gmra.mxu0 %vm315_vm1, %v281_v7 }
  0x29   : > { %1578 = vmatmul.msk.f32.gmra.mxu1 %vm315_vm1, %v289_v8 }
  0x2a   : > { %1586 = vmatmul.msk.f32.gmra.mxu2 %vm315_vm1, %v297_v21 }
  0x2b   : > { %1594 = vmatmul.msk.f32.gmra.mxu3 %vm315_vm1, %v305_v22 }
  0x30   : > { %1571 = vmatmul.msk.f32.gmra.mxu0 %vm315_vm1, %v282_v11 }
  0x31   : > { %1579 = vmatmul.msk.f32.gmra.mxu1 %vm315_vm1, %v290_v12 }
  0x32   : > { %1587 = vmatmul.msk.f32.gmra.mxu2 %vm315_vm1, %v298_v25 }
  0x33   : > { %1595 = vmatmul.msk.f32.gmra.mxu3 %vm315_vm1, %v306_v26 }
  0x38   : > { %1572 = vmatmul.msk.f32.gmra.mxu0 %vm315_vm1, %v283_v15 }
  0x39   : > { %1580 = vmatmul.msk.f32.gmra.mxu1 %vm315_vm1, %v291_v16 }
  0x3a   : > { %1588 = vmatmul.msk.f32.gmra.mxu2 %vm315_vm1, %v299_v27 }
  0x3b   : > { %1596 = vmatmul.msk.f32.gmra.mxu3 %vm315_vm1, %v307_v30 }
  0x40   : > { %1573 = vmatmul.msk.f32.gmra.mxu0 %vm315_vm1, %v284_v19 }
  0x41   : > { %1581 = vmatmul.msk.f32.gmra.mxu1 %vm315_vm1, %v292_v20 }
  0x42   : > { %1589 = vmatmul.msk.f32.gmra.mxu2 %vm315_vm1, %v300_v28  ;;  %v778_v28 = vrot.slane %v1803_v17, 3 }
  0x43   : > { %1597 = vmatmul.msk.f32.gmra.mxu3 %vm315_vm1, %v308_v31 }
  0x44   : > { %v836_v36 = vperm.slane %v778_v28, 0 }
  0x48   : > { %1574 = vmatmul.msk.f32.gmra.mxu0 %vm315_vm1, %v285_v23  ;;  %v776_v23 = vrot.slane %v1803_v17, 1 }
  0x49   : > { %1582 = vmatmul.msk.f32.gmra.mxu1 %vm315_vm1, %v293_v24  ;;  %v777_v24 = vrot.slane %v1803_v17, 2 }
  0x4a   : > { %1590 = vmatmul.msk.f32.gmra.mxu2 %vm315_vm1, %v301_v29  ;;  %v833_v29 = vperm.slane %v1803_v17, 0  ;;  %v834_v33 = vperm.slane %v776_v23, 0 }
  0x4b   : > { %1598 = vmatmul.msk.f32.gmra.mxu3 %vm315_vm1, %v309_v32  ;;  %v835_v35 = vperm.slane %v777_v24, 0 }
  0x8d   : > { %v433_v39 = vpop.f32.mrf.mxu0 }
  0x8e   : > { %v434_v40 = vadd.f32 %v1787_v34, %v433_v39  ;;  %v1805_v18 = vpop.f32.mrf.mxu1 }
  0x90   : > { %v569_v45 = vrot.slane %v434_v40, 2  ;;  %v570_v46 = vrot.slane %v434_v40, 4  ;;  %v571_v47 = vrot.slane %v434_v40, 6  ;;  %v953_v48 = vadd.f32 %v825_v38, %v434_v40 }
  0x92   : > { %v954_v51 = vadd.f32 %v826_v41, %v569_v45  ;;  %v955_v52 = vadd.f32 %v827_v42, %v570_v46  ;;  %v956_v53 = vadd.f32 %v828_v43, %v571_v47  ;;  %1209 = vst [vmem:[#allocation1] ss:$4 sm:$0xff] %v953_v48  ;;  %v782_v48 = vrot.slane %v1803_v17, 7 }
  0x94   : > { %1211 = vst [vmem:[#allocation1 + $0x1] ss:$4 sm:$0xff] %v954_v51 }
  0x95   : > { %1213 = vst [vmem:[#allocation1 + $0x2] ss:$4 sm:$0xff] %v955_v52  ;;  %v436_v56 = vpop.f32.mrf.mxu0 }
  0x96   : > { %1215 = vst [vmem:[#allocation1 + $0x3] ss:$4 sm:$0xff] %v956_v53  ;;  %v437_v57 = vadd.f32 %v1787_v34, %v436_v56 }
  0x98   : > { %v572_v61 = vrot.slane %v437_v57, 2  ;;  %v573_v62 = vrot.slane %v437_v57, 4  ;;  %v574_v63 = vrot.slane %v437_v57, 6  ;;  %v957_v0 = vadd.f32 %v829_v55, %v437_v57 }
  0x9a   : > { %v958_v1 = vadd.f32 %v830_v58, %v572_v61  ;;  %v959_v2 = vadd.f32 %v831_v59, %v573_v62  ;;  %v960_v3 = vadd.f32 %v832_v60, %v574_v63  ;;  %1217 = vst [vmem:[#allocation1 + $0x20] ss:$4 sm:$0xff] %v957_v0 }
  0x9c   : > { %1219 = vst [vmem:[#allocation1 + $0x21] ss:$4 sm:$0xff] %v958_v1 }
  0x9d   : > { %v1224_v4 = vld.sshfl [vmem:[#allocation1] sm:$0xff pattern:$0x73625140]  ;;  %1221 = vst [vmem:[#allocation1 + $0x22] ss:$4 sm:$0xff] %v959_v2  ;;  %v439_v5 = vpop.f32.mrf.mxu0 }
  0x9e   : > { %1223 = vst [vmem:[#allocation1 + $0x23] ss:$4 sm:$0xff] %v960_v3  ;;  %v440_v6 = vadd.f32 %v1787_v34, %v439_v5 }
  0x9f   : > { %1409 = vst.msk [vmem:[%s1796_s7] sm:$0xff] %vm1408_vm2, %v1224_v4 }
  0xa0   : > { %v575_v7 = vrot.slane %v440_v6, 2  ;;  %v576_v8 = vrot.slane %v440_v6, 4  ;;  %v577_v9 = vrot.slane %v440_v6, 6  ;;  %v961_v10 = vadd.f32 %v825_v38, %v440_v6 }
  0xa2   : > { %v962_v11 = vadd.f32 %v826_v41, %v575_v7  ;;  %v963_v12 = vadd.f32 %v827_v42, %v576_v8  ;;  %v964_v13 = vadd.f32 %v828_v43, %v577_v9  ;;  %1226 = vst [vmem:[#allocation1] ss:$4 sm:$0xff] %v961_v10  ;;  %v1817_v42 = vpop.f32.mrf.mxu1  ;;  %v780_v43 = vrot.slane %v1803_v17, 5  ;;  %v1829_v7 = vld [vmem:[%s1780_s28 + $0x10] sm:$0xff] }
  0xa3   : > { %v787_v44 = vrot.slane %v1829_v7, 5 }
  0xa4   : > { %1227 = vst [vmem:[#allocation1 + $0x1] ss:$4 sm:$0xff] %v962_v11  ;;  %v838_v53 = vperm.slane %v780_v43, 0  ;;  %v461_v43 = vadd.f32 %v1787_v34, %v1817_v42 }
  0xa5   : > { %v1225_v14 = vld.sshfl [vmem:[#allocation1 + $0x20] sm:$0xff pattern:$0x73625140]  ;;  %1228 = vst [vmem:[#allocation1 + $0x2] ss:$4 sm:$0xff] %v963_v12  ;;  %v442_v15 = vpop.f32.mrf.mxu0  ;;  %v458_v12 = vadd.f32 %v1787_v34, %v1805_v18 }
  0xa6   : > { %1229 = vst [vmem:[#allocation1 + $0x3] ss:$4 sm:$0xff] %v964_v13  ;;  %v443_v16 = vadd.f32 %v1787_v34, %v442_v15  ;;  %v783_v13 = vrot.slane %v1829_v7, 1  ;;  %v598_v42 = vrot.slane %v461_v43, 6 }
  0xa7   : > { %1410 = vst.msk [vmem:[%s1796_s7 + $0x8] sm:$0xff] %vm1408_vm2, %v1225_v14  ;;  %v593_v18 = vrot.slane %v458_v12, 2  ;;  %v594_v24 = vrot.slane %v458_v12, 4 }
  0xa8   : > { %v578_v19 = vrot.slane %v443_v16, 2  ;;  %v579_v20 = vrot.slane %v443_v16, 4  ;;  %v580_v21 = vrot.slane %v443_v16, 6  ;;  %v965_v22 = vadd.f32 %v829_v55, %v443_v16 }
  0xa9   : > { %v840_v55 = vperm.slane %v782_v48, 0  ;;  %v784_v16 = vrot.slane %v1829_v7, 2  ;;  %v789_v48 = vrot.slane %v1829_v7, 7 }
  0xaa   : > { %v966_v25 = vadd.f32 %v830_v58, %v578_v19  ;;  %v967_v26 = vadd.f32 %v831_v59, %v579_v20  ;;  %v968_v27 = vadd.f32 %v832_v60, %v580_v21  ;;  %1230 = vst [vmem:[#allocation1 + $0x20] ss:$4 sm:$0xff] %v965_v22  ;;  %v463_v63 = vpop.f32.mrf.mxu1  ;;  %v785_v19 = vrot.slane %v1829_v7, 3 }
  0xab   : > { %v841_v20 = vperm.slane %v1829_v7, 0 }
  0xac   : > { %1231 = vst [vmem:[#allocation1 + $0x21] ss:$4 sm:$0xff] %v966_v25  ;;  %v842_v25 = vperm.slane %v783_v13, 0 }
  0xad   : > { %v1234_v30 = vld.sshfl [vmem:[#allocation1] sm:$0xff pattern:$0x73625140]  ;;  %1232 = vst [vmem:[#allocation1 + $0x22] ss:$4 sm:$0xff] %v967_v26  ;;  %v445_v31 = vpop.f32.mrf.mxu0  ;;  %v843_v26 = vperm.slane %v784_v16, 0 }
  0xae   : > { %1233 = vst [vmem:[#allocation1 + $0x23] ss:$4 sm:$0xff] %v968_v27  ;;  %v446_v32 = vadd.f32 %v1787_v34, %v445_v31  ;;  %v844_v31 = vperm.slane %v785_v19, 0 }
  0xaf   : > { %1411 = vst.msk [vmem:[%s1796_s7 + $0x10] sm:$0xff] %vm1408_vm2, %v1234_v30  ;;  %v595_v30 = vrot.slane %v458_v12, 6 }
  0xb0   : > { %v581_v38 = vrot.slane %v446_v32, 2  ;;  %v582_v39 = vrot.slane %v446_v32, 4  ;;  %v583_v40 = vrot.slane %v446_v32, 6  ;;  %v969_v41 = vadd.f32 %v833_v29, %v446_v32 }
  0xb1   : > { %v985_v32 = vadd.f32 %v841_v20, %v458_v12 }
  0xb2   : > { %v970_v45 = vadd.f32 %v834_v33, %v581_v38  ;;  %v971_v46 = vadd.f32 %v835_v35, %v582_v39  ;;  %v972_v47 = vadd.f32 %v836_v36, %v583_v40  ;;  %1236 = vst [vmem:[#allocation1] ss:$4 sm:$0xff] %v969_v41  ;;  %v1831_v11 = vpop.f32.mrf.mxu1  ;;  %v988_v39 = vadd.f32 %v844_v31, %v595_v30 }
  0xb3   : > { %v464_v40 = vadd.f32 %v1787_v34, %v463_v63  ;;  %v786_v41 = vrot.slane %v1829_v7, 4 }
  0xb4   : > { %1237 = vst [vmem:[#allocation1 + $0x1] ss:$4 sm:$0xff] %v970_v45 }
  0xb5   : > { %v1235_v50 = vld.sshfl [vmem:[#allocation1 + $0x20] sm:$0xff pattern:$0x73625140]  ;;  %1238 = vst [vmem:[#allocation1 + $0x2] ss:$4 sm:$0xff] %v971_v46  ;;  %v448_v51 = vpop.f32.mrf.mxu0  ;;  %v599_v45 = vrot.slane %v464_v40, 2 }
  0xb6   : > { %1239 = vst [vmem:[#allocation1 + $0x3] ss:$4 sm:$0xff] %v972_v47  ;;  %v449_v52 = vadd.f32 %v1787_v34, %v448_v51  ;;  %v788_v46 = vrot.slane %v1829_v7, 6  ;;  %v600_v47 = vrot.slane %v464_v40, 4  ;;  %v993_v51 = vadd.f32 %v841_v20, %v464_v40 }
  0xb7   : > { %1412 = vst.msk [vmem:[%s1796_s7 + $0x18] sm:$0xff] %vm1408_vm2, %v1235_v50  ;;  %v845_v50 = vperm.slane %v786_v41, 0 }
  0xb8   : > { %v584_v56 = vrot.slane %v449_v52, 2  ;;  %v585_v57 = vrot.slane %v449_v52, 4  ;;  %v586_v58 = vrot.slane %v449_v52, 6  ;;  %v973_v59 = vadd.f32 %v837_v49, %v449_v52 }
  0xb9   : > { %v596_v52 = vrot.slane %v461_v43, 2 }
  0xba   : > { %v974_v60 = vadd.f32 %v838_v53, %v584_v56  ;;  %v975_v61 = vadd.f32 %v839_v54, %v585_v57  ;;  %v976_v62 = vadd.f32 %v840_v55, %v586_v58  ;;  %1240 = vst [vmem:[#allocation1 + $0x20] ss:$4 sm:$0xff] %v973_v59  ;;  %v469_v38 = vpop.f32.mrf.mxu1  ;;  %v1852_v56 = vld [vmem:[%s1780_s28 + $0x18] sm:$0xff]  ;;  %v597_v58 = vrot.slane %v461_v43, 4 }
  0xbb   : > { %v847_v59 = vperm.slane %v788_v46, 0 }
  0xbc   : > { %1241 = vst [vmem:[#allocation1 + $0x21] ss:$4 sm:$0xff] %v974_v60  ;;  %v995_v60 = vadd.f32 %v843_v26, %v600_v47 }
  0xbd   : > { %v1244_v0 = vld.sshfl [vmem:[#allocation1] sm:$0xff pattern:$0x73625140]  ;;  %1242 = vst [vmem:[#allocation1 + $0x22] ss:$4 sm:$0xff] %v975_v61  ;;  %v451_v1 = vpop.f32.mrf.mxu0  ;;  %v848_v61 = vperm.slane %v789_v48, 0 }
  0xbe   : > { %1243 = vst [vmem:[#allocation1 + $0x23] ss:$4 sm:$0xff] %v976_v62  ;;  %v452_v2 = vadd.f32 %v1787_v34, %v451_v1  ;;  %v470_v1 = vadd.f32 %v1787_v34, %v469_v38 }
  0xbf   : > { %1413 = vst.msk [vmem:[%s1796_s7 + $0x20] sm:$0xff] %vm1408_vm2, %v1244_v0  ;;  %v989_v0 = vadd.f32 %v845_v50, %v461_v43  ;;  %v992_v7 = vadd.f32 %v848_v61, %v598_v42 }
  0xc0   : > { %v587_v3 = vrot.slane %v452_v2, 2  ;;  %v588_v4 = vrot.slane %v452_v2, 4  ;;  %v589_v5 = vrot.slane %v452_v2, 6  ;;  %v977_v6 = vadd.f32 %v833_v29, %v452_v2 }
  0xc1   : > { %v790_v2 = vrot.slane %v1852_v56, 1  ;;  %v606_v13 = vrot.slane %v470_v1, 4 }
  0xc2   : > { %v978_v8 = vadd.f32 %v834_v33, %v587_v3  ;;  %v979_v9 = vadd.f32 %v835_v35, %v588_v4  ;;  %v980_v10 = vadd.f32 %v836_v36, %v589_v5  ;;  %1246 = vst [vmem:[#allocation1] ss:$4 sm:$0xff] %v977_v6  ;;  %v986_v33 = vadd.f32 %v842_v25, %v593_v18  ;;  %v472_v57 = vpop.f32.mrf.mxu1 }
  0xc3   : > { %v987_v36 = vadd.f32 %v843_v26, %v594_v24  ;;  %v791_v4 = vrot.slane %v1852_v56, 2  ;;  %v991_v5 = vadd.f32 %v847_v59, %v597_v58  ;;  %v792_v6 = vrot.slane %v1852_v56, 3 }
  0xc4   : > { %1247 = vst [vmem:[#allocation1 + $0x1] ss:$4 sm:$0xff] %v978_v8  ;;  %v849_v8 = vperm.slane %v1852_v56, 0  ;;  %v850_v12 = vperm.slane %v790_v2, 0 }
  0xc5   : > { %v1245_v14 = vld.sshfl [vmem:[#allocation1 + $0x20] sm:$0xff pattern:$0x73625140]  ;;  %1248 = vst [vmem:[#allocation1 + $0x2] ss:$4 sm:$0xff] %v979_v9  ;;  %v454_v15 = vpop.f32.mrf.mxu0  ;;  %v467_v9 = vadd.f32 %v1787_v34, %v1831_v11  ;;  %v852_v16 = vperm.slane %v792_v6, 0 }
  0xc6   : > { %1249 = vst [vmem:[#allocation1 + $0x3] ss:$4 sm:$0xff] %v980_v10  ;;  %v455_v17 = vadd.f32 %v1787_v34, %v454_v15  ;;  %v605_v10 = vrot.slane %v470_v1, 2  ;;  %v607_v15 = vrot.slane %v470_v1, 6  ;;  %v1001_v19 = vadd.f32 %v849_v8, %v470_v1 }
  0xc7   : > { %1414 = vst.msk [vmem:[%s1796_s7 + $0x28] sm:$0xff] %vm1408_vm2, %v1245_v14  ;;  %v851_v14 = vperm.slane %v791_v4, 0  ;;  %v603_v18 = vrot.slane %v467_v9, 4  ;;  %v604_v24 = vrot.slane %v467_v9, 6 }
  0xc8   : > { %v590_v21 = vrot.slane %v455_v17, 2  ;;  %v591_v22 = vrot.slane %v455_v17, 4  ;;  %v981_v23 = vadd.f32 %v837_v49, %v455_v17  ;;  %v592_v27 = vrot.slane %v455_v17, 6  ;;  %v1863_v17 = vpop.f32.mrf.mxu2 }
  0xc9   : > { %v601_v49 = vrot.slane %v464_v40, 6  ;;  %v1003_v11 = vadd.f32 %v851_v14, %v606_v13  ;;  %v999_v30 = vadd.f32 %v847_v59, %v603_v18  ;;  %v796_v40 = vrot.slane %v1852_v56, 7 }
  0xca   : > { %v982_v28 = vadd.f32 %v838_v53, %v590_v21  ;;  %v983_v29 = vadd.f32 %v839_v54, %v591_v22  ;;  %1250 = vst [vmem:[#allocation1 + $0x20] ss:$4 sm:$0xff] %v981_v23  ;;  %v984_v37 = vadd.f32 %v840_v55, %v592_v27  ;;  %v846_v53 = vperm.slane %v787_v44, 0  ;;  %v475_v20 = vpop.f32.mrf.mxu1 }
  0xcb   : > { %v994_v55 = vadd.f32 %v842_v25, %v599_v45  ;;  %v996_v62 = vadd.f32 %v844_v31, %v601_v49  ;;  %v602_v22 = vrot.slane %v467_v9, 2  ;;  %v1002_v23 = vadd.f32 %v850_v12, %v605_v10 }
  0xcc   : > { %1251 = vst [vmem:[#allocation1 + $0x21] ss:$4 sm:$0xff] %v982_v28  ;;  %v990_v3 = vadd.f32 %v846_v53, %v596_v52  ;;  %v1004_v25 = vadd.f32 %v852_v16, %v607_v15  ;;  %v476_v26 = vadd.f32 %v1787_v34, %v475_v20  ;;  %v997_v27 = vadd.f32 %v845_v50, %v467_v9 }
  0xcd   : > { %v1254_v35 = vld.sshfl [vmem:[#allocation1] sm:$0xff pattern:$0x73625140]  ;;  %1252 = vst [vmem:[#allocation1 + $0x22] ss:$4 sm:$0xff] %v983_v29  ;;  %v998_v29 = vadd.f32 %v846_v53, %v602_v22  ;;  %v1000_v31 = vadd.f32 %v848_v61, %v604_v24  ;;  %v856_v53 = vperm.slane %v796_v40, 0  ;;  %v482_v61 = vadd.f32 %v1787_v34, %v1863_v17 }
  0xce   : > { %1256 = vst [vmem:[#allocation1] ss:$4 sm:$0xff] %v985_v32  ;;  %v611_v32 = vrot.slane %v476_v26, 2  ;;  %v1009_v45 = vadd.f32 %v849_v8, %v476_v26 }
  0xcf   : > { %1257 = vst [vmem:[#allocation1 + $0x1] ss:$4 sm:$0xff] %v986_v33  ;;  %v793_v33 = vrot.slane %v1852_v56, 4  ;;  %v617_v4 = vrot.slane %v482_v61, 2  ;;  %v618_v6 = vrot.slane %v482_v61, 4  ;;  %v619_v8 = vrot.slane %v482_v61, 6 }
  0xd0   : > { %1258 = vst [vmem:[#allocation1 + $0x2] ss:$4 sm:$0xff] %v987_v36  ;;  %v473_v36 = vadd.f32 %v1787_v34, %v472_v57  ;;  %v1871_v38 = vpop.f32.mrf.mxu2  ;;  %v1010_v41 = vadd.f32 %v850_v12, %v611_v32  ;;  %v1884_v57 = vld [vmem:[%s1780_s28 + $0x20] sm:$0xff] }
  0xd1   : > { %1259 = vst [vmem:[#allocation1 + $0x3] ss:$4 sm:$0xff] %v988_v39  ;;  %v795_v39 = vrot.slane %v1852_v56, 6  ;;  %v853_v44 = vperm.slane %v793_v33, 0  ;;  %v799_v1 = vrot.slane %v1884_v57, 3  ;;  %v857_v2 = vperm.slane %v1884_v57, 0 }
  0xd2   : > { %1253 = vst [vmem:[#allocation1 + $0x23] ss:$4 sm:$0xff] %v984_v37  ;;  %v794_v37 = vrot.slane %v1852_v56, 5  ;;  %v608_v47 = vrot.slane %v473_v36, 2  ;;  %v609_v49 = vrot.slane %v473_v36, 4  ;;  %v610_v52 = vrot.slane %v473_v36, 6 }
  0xd3   : > { %1415 = vst.msk [vmem:[%s1796_s7 + $0x30] sm:$0xff] %vm1408_vm2, %v1254_v35  ;;  %v612_v35 = vrot.slane %v476_v26, 4  ;;  %v855_v50 = vperm.slane %v795_v39, 0  ;;  %v860_v9 = vperm.slane %v799_v1, 0  ;;  %v1017_v10 = vadd.f32 %v857_v2, %v482_v61 }
  0xd4   : > { %v854_v48 = vperm.slane %v794_v37, 0  ;;  %v1008_v59 = vadd.f32 %v856_v53, %v610_v52 }
  0xd5   : > { %v1011_v46 = vadd.f32 %v851_v14, %v612_v35  ;;  %v1007_v58 = vadd.f32 %v855_v50, %v609_v49 }
  0xd6   : > { %v1006_v56 = vadd.f32 %v854_v48, %v608_v47 }
  0xd8   : > { %v1264_v54 = vld.sshfl [vmem:[#allocation1] sm:$0xff pattern:$0x73625140] }
  0xd9   : > { %1266 = vst [vmem:[#allocation1] ss:$4 sm:$0xff] %v993_v51  ;;  %v1255_v63 = vld.sshfl [vmem:[#allocation1 + $0x20] sm:$0xff pattern:$0x73625140]  ;;  %v613_v51 = vrot.slane %v476_v26, 6  ;;  %v485_v26 = vadd.f32 %v1787_v34, %v1871_v38 }
  0xda   : > { %1267 = vst [vmem:[#allocation1 + $0x1] ss:$4 sm:$0xff] %v994_v55  ;;  %v1005_v55 = vadd.f32 %v853_v44, %v473_v36 }
  0xdb   : > { %1268 = vst [vmem:[#allocation1 + $0x2] ss:$4 sm:$0xff] %v995_v60  ;;  %v1012_v42 = vadd.f32 %v852_v16, %v613_v51  ;;  %v487_v60 = vpop.f32.mrf.mxu2  ;;  %v620_v39 = vrot.slane %v485_v26, 2 }
  0xdc   : > { %1269 = vst [vmem:[#allocation1 + $0x3] ss:$4 sm:$0xff] %v996_v62  ;;  %v797_v62 = vrot.slane %v1884_v57, 1 }
  0xdd   : > { %1260 = vst [vmem:[#allocation1 + $0x20] ss:$4 sm:$0xff] %v989_v0  ;;  %v798_v0 = vrot.slane %v1884_v57, 2 }
  0xde   : > { %1261 = vst [vmem:[#allocation1 + $0x21] ss:$4 sm:$0xff] %v990_v3 }
  0xdf   : > { %1262 = vst [vmem:[#allocation1 + $0x22] ss:$4 sm:$0xff] %v991_v5  ;;  %v858_v5 = vperm.slane %v797_v62, 0 }
  0xe0   : > { %1263 = vst [vmem:[#allocation1 + $0x23] ss:$4 sm:$0xff] %v992_v7  ;;  %v859_v7 = vperm.slane %v798_v0, 0 }
  0xe1   : > { %1416 = vst.msk [vmem:[%s1796_s7 + $0x38] sm:$0xff] %vm1408_vm2, %v1255_v63  ;;  %v478_v63 = vpop.f32.mrf.mxu1  ;;  %v1018_v14 = vadd.f32 %v858_v5, %v617_v4 }
  0xe2   : > { %1417 = vst.msk [vmem:[%s1796_s7 + $0x40] sm:$0xff] %vm1408_vm2, %v1264_v54  ;;  %v479_v3 = vadd.f32 %v1787_v34, %v478_v63 }
  0xe3   : > { %v1274_v21 = vld.sshfl [vmem:[#allocation1] sm:$0xff pattern:$0x73625140]  ;;  %v490_v17 = vpop.f32.mrf.mxu2 }
  0xe4   : > { %1276 = vst [vmem:[#allocation1] ss:$4 sm:$0xff] %v1001_v19  ;;  %v614_v13 = vrot.slane %v479_v3, 2  ;;  %v615_v16 = vrot.slane %v479_v3, 4  ;;  %v1019_v19 = vadd.f32 %v859_v7, %v618_v6  ;;  %v616_v20 = vrot.slane %v479_v3, 6 }
  0xe5   : > { %1277 = vst [vmem:[#allocation1 + $0x1] ss:$4 sm:$0xff] %v1002_v23  ;;  %v488_v23 = vadd.f32 %v1787_v34, %v487_v60  ;;  %v1013_v18 = vadd.f32 %v853_v44, %v479_v3 }
  0xe6   : > { %1278 = vst [vmem:[#allocation1 + $0x2] ss:$4 sm:$0xff] %v1003_v11  ;;  %v1014_v22 = vadd.f32 %v854_v48, %v614_v13  ;;  %v1015_v11 = vadd.f32 %v855_v50, %v615_v16  ;;  %v1016_v24 = vadd.f32 %v856_v53, %v616_v20 }
  0xe7   : > { %v1265_v28 = vld.sshfl [vmem:[#allocation1 + $0x20] sm:$0xff pattern:$0x73625140]  ;;  %1279 = vst [vmem:[#allocation1 + $0x3] ss:$4 sm:$0xff] %v1004_v25  ;;  %v800_v25 = vrot.slane %v1884_v57, 4  ;;  %v1025_v37 = vadd.f32 %v857_v2, %v488_v23 }
  0xe8   : > { %1270 = vst [vmem:[#allocation1 + $0x20] ss:$4 sm:$0xff] %v997_v27  ;;  %v801_v27 = vrot.slane %v1884_v57, 5  ;;  %v625_v32 = vrot.slane %v488_v23, 6 }
  0xe9   : > { %1271 = vst [vmem:[#allocation1 + $0x21] ss:$4 sm:$0xff] %v998_v29  ;;  %v802_v29 = vrot.slane %v1884_v57, 6  ;;  %v861_v35 = vperm.slane %v800_v25, 0 }
  0xea   : > { %1272 = vst [vmem:[#allocation1 + $0x22] ss:$4 sm:$0xff] %v999_v30  ;;  %v624_v30 = vrot.slane %v488_v23, 4  ;;  %v862_v40 = vperm.slane %v801_v27, 0  ;;  %v1028_v48 = vadd.f32 %v860_v9, %v625_v32 }
  0xeb   : > { %1273 = vst [vmem:[#allocation1 + $0x23] ss:$4 sm:$0xff] %v1000_v31  ;;  %v803_v31 = vrot.slane %v1884_v57, 7  ;;  %v493_v33 = vpop.f32.mrf.mxu2  ;;  %v1021_v49 = vadd.f32 %v861_v35, %v485_v26 }
  0xec   : > { %1418 = vst.msk [vmem:[%s1796_s7 + $0x48] sm:$0xff] %vm1408_vm2, %v1265_v28  ;;  %v623_v28 = vrot.slane %v488_v23, 2  ;;  %v1027_v44 = vadd.f32 %v859_v7, %v624_v30  ;;  %v1022_v50 = vadd.f32 %v862_v40, %v620_v39  ;;  %v494_v52 = vadd.f32 %v1787_v34, %v493_v33 }
  0xed   : > { %1419 = vst.msk [vmem:[%s1796_s7 + $0x50] sm:$0xff] %vm1408_vm2, %v1274_v21  ;;  %v1020_v21 = vadd.f32 %v860_v9, %v619_v8  ;;  %v864_v47 = vperm.slane %v803_v31, 0  ;;  %v505_v8 = vpop.f32.mrf.mxu3 }
  0xee   : > { %v1284_v43 = vld.sshfl [vmem:[#allocation1] sm:$0xff pattern:$0x73625140]  ;;  %v1026_v38 = vadd.f32 %v858_v5, %v623_v28  ;;  %v630_v61 = vrot.slane %v494_v52, 4  ;;  %v631_v7 = vrot.slane %v494_v52, 6 }
  0xef   : > { %1421 = vst.msk [vmem:[%s1796_s7 + $0x60] sm:$0xff] %vm1408_vm2, %v1284_v43  ;;  %v863_v43 = vperm.slane %v802_v29, 0 }
  0xf0   : > { %1286 = vst [vmem:[#allocation1] ss:$4 sm:$0xff] %v1009_v45  ;;  %v1907_v45 = vld [vmem:[%s1780_s28 + $0x28] sm:$0xff] }
  0xf1   : > { %1287 = vst [vmem:[#allocation1 + $0x1] ss:$4 sm:$0xff] %v1010_v41  ;;  %v621_v41 = vrot.slane %v485_v26, 4  ;;  %v804_v53 = vrot.slane %v1907_v45, 1  ;;  %v865_v57 = vperm.slane %v1907_v45, 0  ;;  %v806_v0 = vrot.slane %v1907_v45, 3 }
  0xf2   : > { %v1275_v54 = vld.sshfl [vmem:[#allocation1 + $0x20] sm:$0xff pattern:$0x73625140]  ;;  %1288 = vst [vmem:[#allocation1 + $0x2] ss:$4 sm:$0xff] %v1011_v46  ;;  %v622_v46 = vrot.slane %v485_v26, 6 }
  0xf3   : > { %1420 = vst.msk [vmem:[%s1796_s7 + $0x58] sm:$0xff] %vm1408_vm2, %v1275_v54  ;;  %v1023_v54 = vadd.f32 %v863_v43, %v621_v41  ;;  %v496_v60 = vpop.f32.mrf.mxu2  ;;  %v1033_v1 = vadd.f32 %v865_v57, %v494_v52  ;;  %v810_v23 = vrot.slane %v1907_v45, 7 }
  0xf4   : > { %1280 = vst [vmem:[#allocation1 + $0x20] ss:$4 sm:$0xff] %v1005_v55  ;;  %v805_v55 = vrot.slane %v1907_v45, 2  ;;  %v497_v20 = vadd.f32 %v1787_v34, %v496_v60 }
  0xf5   : > { %1281 = vst [vmem:[#allocation1 + $0x21] ss:$4 sm:$0xff] %v1006_v56  ;;  %v1024_v56 = vadd.f32 %v864_v47, %v622_v46  ;;  %v872_v31 = vperm.slane %v810_v23, 0 }
  0xf6   : > { %1282 = vst [vmem:[#allocation1 + $0x22] ss:$4 sm:$0xff] %v1007_v58  ;;  %v491_v58 = vadd.f32 %v1787_v34, %v490_v17  ;;  %v867_v62 = vperm.slane %v805_v55, 0  ;;  %v632_v25 = vrot.slane %v497_v20, 2  ;;  %v633_v27 = vrot.slane %v497_v20, 4 }
  0xf7   : > { %1283 = vst [vmem:[#allocation1 + $0x23] ss:$4 sm:$0xff] %v1008_v59  ;;  %v866_v59 = vperm.slane %v804_v53, 0  ;;  %v634_v30 = vrot.slane %v497_v20, 6 }
  0xf8   : > { %1289 = vst [vmem:[#allocation1 + $0x3] ss:$4 sm:$0xff] %v1012_v42  ;;  %v629_v42 = vrot.slane %v494_v52, 2  ;;  %v626_v2 = vrot.slane %v491_v58, 2  ;;  %v627_v4 = vrot.slane %v491_v58, 4  ;;  %v1035_v5 = vadd.f32 %v867_v62, %v630_v61 }
  0xf9   : > { %v628_v6 = vrot.slane %v491_v58, 6  ;;  %v1040_v41 = vadd.f32 %v872_v31, %v634_v30  ;;  %v506_v52 = vadd.f32 %v1787_v34, %v505_v8  ;;  %v1960_v30 = vld [vmem:[%s1780_s28 + $0x38] sm:$0xff] }
  0xfa   : > { %v1034_v3 = vadd.f32 %v866_v59, %v629_v42  ;;  %v1030_v13 = vadd.f32 %v862_v40, %v626_v2 }
  0xfb   : > { %v499_v16 = vpop.f32.mrf.mxu2 }
  0xfe   : > { %v1285_v12 = vld.sshfl [vmem:[#allocation1 + $0x20] sm:$0xff pattern:$0x73625140] }
  0xff   : > { %1422 = vst.msk [vmem:[%s1796_s7 + $0x68] sm:$0xff] %vm1408_vm2, %v1285_v12  ;;  %v1294_v15 = vld.sshfl [vmem:[#allocation1] sm:$0xff pattern:$0x73625140]  ;;  %v868_v12 = vperm.slane %v806_v0, 0  ;;  %v643_v0 = vrot.slane %v506_v52, 6 }
 0x100   : > { %1296 = vst [vmem:[#allocation1] ss:$4 sm:$0xff] %v1017_v10  ;;  %v1029_v10 = vadd.f32 %v861_v35, %v491_v58  ;;  %v641_v58 = vrot.slane %v506_v52, 2 }
 0x101   : > { %1297 = vst [vmem:[#allocation1 + $0x1] ss:$4 sm:$0xff] %v1018_v14  ;;  %v1031_v14 = vadd.f32 %v863_v43, %v627_v4  ;;  %v1036_v17 = vadd.f32 %v868_v12, %v631_v7 }
 0x102   : > { %1298 = vst [vmem:[#allocation1 + $0x2] ss:$4 sm:$0xff] %v1019_v19  ;;  %v807_v19 = vrot.slane %v1907_v45, 4 }
 0x103   : > { %1299 = vst [vmem:[#allocation1 + $0x3] ss:$4 sm:$0xff] %v1020_v21  ;;  %v808_v21 = vrot.slane %v1907_v45, 5 }
 0x104   : > { %1423 = vst.msk [vmem:[%s1796_s7 + $0x70] sm:$0xff] %vm1408_vm2, %v1294_v15  ;;  %v1032_v15 = vadd.f32 %v864_v47, %v628_v6 }
 0x105   : > { %1290 = vst [vmem:[#allocation1 + $0x20] ss:$4 sm:$0xff] %v1013_v18  ;;  %v500_v18 = vadd.f32 %v1787_v34, %v499_v16  ;;  %v870_v26 = vperm.slane %v808_v21, 0 }
 0x106   : > { %1291 = vst [vmem:[#allocation1 + $0x21] ss:$4 sm:$0xff] %v1014_v22  ;;  %v809_v22 = vrot.slane %v1907_v45, 6 }
 0x107   : > { %1292 = vst [vmem:[#allocation1 + $0x22] ss:$4 sm:$0xff] %v1015_v11  ;;  %v869_v11 = vperm.slane %v807_v19, 0  ;;  %v635_v32 = vrot.slane %v500_v18, 2  ;;  %v1038_v39 = vadd.f32 %v870_v26, %v632_v25  ;;  %v637_v40 = vrot.slane %v500_v18, 6 }
 0x108   : > { %1293 = vst [vmem:[#allocation1 + $0x23] ss:$4 sm:$0xff] %v1016_v24  ;;  %v1929_v24 = vpop.f32.mrf.mxu3  ;;  %v871_v28 = vperm.slane %v809_v22, 0  ;;  %v1041_v46 = vadd.f32 %v865_v57, %v500_v18 }
 0x109   : > { %v1037_v35 = vadd.f32 %v869_v11, %v497_v20  ;;  %v1042_v43 = vadd.f32 %v866_v59, %v635_v32 }
 0x10a   : > { %v1304_v36 = vld.sshfl [vmem:[#allocation1] sm:$0xff pattern:$0x73625140] }
 0x10b   : > { %1425 = vst.msk [vmem:[%s1796_s7 + $0x80] sm:$0xff] %vm1408_vm2, %v1304_v36  ;;  %v636_v36 = vrot.slane %v500_v18, 4 }
 0x10c   : > { %1306 = vst [vmem:[#allocation1] ss:$4 sm:$0xff] %v1025_v37  ;;  %v502_v37 = vpop.f32.mrf.mxu2 }
 0x10d   : > { %1307 = vst [vmem:[#allocation1 + $0x1] ss:$4 sm:$0xff] %v1026_v38  ;;  %v1039_v38 = vadd.f32 %v871_v28, %v633_v27  ;;  %v1043_v47 = vadd.f32 %v867_v62, %v636_v36  ;;  %v642_v62 = vrot.slane %v506_v52, 4 }
 0x10e   : > { %1308 = vst [vmem:[#allocation1 + $0x2] ss:$4 sm:$0xff] %v1027_v44  ;;  %v503_v44 = vadd.f32 %v1787_v34, %v502_v37 }
 0x10f   : > { %1309 = vst [vmem:[#allocation1 + $0x3] ss:$4 sm:$0xff] %v1028_v48  ;;  %v1295_v51 = vld.sshfl [vmem:[#allocation1 + $0x20] sm:$0xff pattern:$0x73625140]  ;;  %v1939_v48 = vld [vmem:[%s1780_s28 + $0x30] sm:$0xff] }
 0x110   : > { %1300 = vst [vmem:[#allocation1 + $0x20] ss:$4 sm:$0xff] %v1021_v49  ;;  %v1044_v49 = vadd.f32 %v868_v12, %v637_v40  ;;  %v811_v53 = vrot.slane %v1939_v48, 1  ;;  %v812_v55 = vrot.slane %v1939_v48, 2  ;;  %v813_v45 = vrot.slane %v1939_v48, 3 }
 0x111   : > { %1301 = vst [vmem:[#allocation1 + $0x21] ss:$4 sm:$0xff] %v1022_v50  ;;  %v511_v50 = vpop.f32.mrf.mxu3  ;;  %v1045_v60 = vadd.f32 %v869_v11, %v503_v44  ;;  %v640_v2 = vrot.slane %v503_v44, 6  ;;  %v814_v12 = vrot.slane %v1939_v48, 4  ;;  %v816_v16 = vrot.slane %v1939_v48, 6 }
 0x112   : > { %1302 = vst [vmem:[#allocation1 + $0x22] ss:$4 sm:$0xff] %v1023_v54  ;;  %v639_v54 = vrot.slane %v503_v44, 4  ;;  %v874_v42 = vperm.slane %v811_v53, 0  ;;  %v817_v19 = vrot.slane %v1939_v48, 7 }
 0x113   : > { %1303 = vst [vmem:[#allocation1 + $0x23] ss:$4 sm:$0xff] %v1024_v56  ;;  %v873_v56 = vperm.slane %v1939_v48, 0  ;;  %v877_v22 = vperm.slane %v814_v12, 0 }
 0x114   : > { %1424 = vst.msk [vmem:[%s1796_s7 + $0x78] sm:$0xff] %vm1408_vm2, %v1295_v51  ;;  %v638_v51 = vrot.slane %v503_v44, 2  ;;  %v1047_v61 = vadd.f32 %v871_v28, %v639_v54  ;;  %v1050_v4 = vadd.f32 %v874_v42, %v641_v58  ;;  %v879_v28 = vperm.slane %v816_v16, 0  ;;  %v1969_v44 = vld [vmem:[%s2012_s3] ss:$0 sm:$0xff] }
 0x116   : > { %v1314_v63 = vld.sshfl [vmem:[#allocation1] sm:$0xff pattern:$0x73625140]  ;;  %v1046_v57 = vadd.f32 %v870_v26, %v638_v51 }
 0x117   : > { %1427 = vst.msk [vmem:[%s1796_s7 + $0x90] sm:$0xff] %vm1408_vm2, %v1314_v63  ;;  %v875_v63 = vperm.slane %v812_v55, 0 }
 0x118   : > { %1316 = vst [vmem:[#allocation1] ss:$4 sm:$0xff] %v1033_v1  ;;  %v876_v1 = vperm.slane %v813_v45, 0 }
 0x119   : > { %1317 = vst [vmem:[#allocation1 + $0x1] ss:$4 sm:$0xff] %v1034_v3  ;;  %v1049_v3 = vadd.f32 %v873_v56, %v506_v52  ;;  %v514_v6 = vpop.f32.mrf.mxu3  ;;  %v1051_v7 = vadd.f32 %v875_v63, %v642_v62  ;;  %v820_v52 = vrot.slane %v1960_v30, 3 }
 0x11a   : > { %v1305_v9 = vld.sshfl [vmem:[#allocation1 + $0x20] sm:$0xff pattern:$0x73625140]  ;;  %1318 = vst [vmem:[#allocation1 + $0x2] ss:$4 sm:$0xff] %v1035_v5  ;;  %v1052_v8 = vadd.f32 %v876_v1, %v643_v0 }
 0x11b   : > { %1426 = vst.msk [vmem:[%s1796_s7 + $0x88] sm:$0xff] %vm1408_vm2, %v1305_v9  ;;  %v1048_v9 = vadd.f32 %v872_v31, %v640_v2  ;;  %v880_v31 = vperm.slane %v817_v19, 0  ;;  %v821_v2 = vrot.slane %v1960_v30, 4 }
 0x11c   : > { %1310 = vst [vmem:[#allocation1 + $0x20] ss:$4 sm:$0xff] %v1029_v10  ;;  %v512_v10 = vadd.f32 %v1787_v34, %v511_v50 }
 0x11d   : > { %1311 = vst [vmem:[#allocation1 + $0x21] ss:$4 sm:$0xff] %v1030_v13  ;;  %v509_v13 = vadd.f32 %v1787_v34, %v1929_v24 }
 0x11e   : > { %1312 = vst [vmem:[#allocation1 + $0x22] ss:$4 sm:$0xff] %v1031_v14  ;;  %v815_v14 = vrot.slane %v1939_v48, 5  ;;  %v649_v20 = vrot.slane %v512_v10, 6  ;;  %v1057_v18 = vadd.f32 %v873_v56, %v512_v10 }
 0x11f   : > { %1313 = vst [vmem:[#allocation1 + $0x23] ss:$4 sm:$0xff] %v1032_v15  ;;  %v647_v15 = vrot.slane %v512_v10, 2  ;;  %v644_v11 = vrot.slane %v509_v13, 2  ;;  %v645_v24 = vrot.slane %v509_v13, 4  ;;  %v646_v27 = vrot.slane %v509_v13, 6 }
 0x120   : > { %1319 = vst [vmem:[#allocation1 + $0x3] ss:$4 sm:$0xff] %v1036_v17  ;;  %v648_v17 = vrot.slane %v512_v10, 4  ;;  %v878_v25 = vperm.slane %v815_v14, 0  ;;  %v1060_v32 = vadd.f32 %v876_v1, %v649_v20 }
 0x121   : > { %v517_v21 = vpop.f32.mrf.mxu3  ;;  %v1058_v26 = vadd.f32 %v874_v42, %v647_v15  ;;  %v1055_v40 = vadd.f32 %v879_v28, %v645_v24 }
 0x122   : > { %v1054_v36 = vadd.f32 %v878_v25, %v644_v11  ;;  %v518_v37 = vadd.f32 %v1787_v34, %v517_v21  ;;  %v515_v34 = vadd.f32 %v1969_v44, %v514_v6  ;;  %v824_v6 = vrot.slane %v1960_v30, 7 }
 0x124   : > { %v650_v54 = vrot.slane %v515_v34, 2  ;;  %v651_v45 = vrot.slane %v515_v34, 4  ;;  %v655_v58 = vrot.slane %v518_v37, 6  ;;  %v888_v16 = vperm.slane %v824_v6, 0 }
 0x126   : > { %v1315_v29 = vld.sshfl [vmem:[#allocation1 + $0x20] sm:$0xff pattern:$0x73625140]  ;;  %v1063_v62 = vadd.f32 %v879_v28, %v651_v45 }
 0x127   : > { %1428 = vst.msk [vmem:[%s1796_s7 + $0x98] sm:$0xff] %vm1408_vm2, %v1315_v29  ;;  %v1324_v33 = vld.sshfl [vmem:[#allocation1] sm:$0xff pattern:$0x73625140]  ;;  %v1059_v29 = vadd.f32 %v875_v63, %v648_v17 }
 0x128   : > { %1429 = vst.msk [vmem:[%s1796_s7 + $0xa0] sm:$0xff] %vm1408_vm2, %v1324_v33 }
 0x129   : > { %1320 = vst [vmem:[#allocation1 + $0x20] ss:$4 sm:$0xff] %v1037_v35  ;;  %v1053_v35 = vadd.f32 %v877_v22, %v509_v13  ;;  %v520_v48 = vpop.f32.mrf.mxu3 }
 0x12a   : > { %1321 = vst [vmem:[#allocation1 + $0x21] ss:$4 sm:$0xff] %v1038_v39  ;;  %v818_v39 = vrot.slane %v1960_v30, 1 }
 0x12b   : > { %1322 = vst [vmem:[#allocation1 + $0x22] ss:$4 sm:$0xff] %v1039_v38  ;;  %v819_v38 = vrot.slane %v1960_v30, 2 }
 0x12c   : > { %1323 = vst [vmem:[#allocation1 + $0x23] ss:$4 sm:$0xff] %v1040_v41  ;;  %v1056_v41 = vadd.f32 %v880_v31, %v646_v27 }
 0x12d   : > { %1326 = vst [vmem:[#allocation1] ss:$4 sm:$0xff] %v1041_v46  ;;  %v653_v46 = vrot.slane %v518_v37, 2  ;;  %v883_v50 = vperm.slane %v819_v38, 0 }
 0x12e   : > { %1327 = vst [vmem:[#allocation1 + $0x1] ss:$4 sm:$0xff] %v1042_v43  ;;  %v881_v43 = vperm.slane %v1960_v30, 0 }
 0x12f   : > { %1328 = vst [vmem:[#allocation1 + $0x2] ss:$4 sm:$0xff] %v1043_v47  ;;  %v882_v47 = vperm.slane %v818_v39, 0 }
 0x130   : > { %1329 = vst [vmem:[#allocation1 + $0x3] ss:$4 sm:$0xff] %v1044_v49  ;;  %v654_v49 = vrot.slane %v518_v37, 4  ;;  %v1065_v53 = vadd.f32 %v881_v43, %v518_v37 }
 0x131   : > { %v1066_v55 = vadd.f32 %v882_v47, %v653_v46  ;;  %v523_v0 = vpop.f32.mrf.mxu3 }
 0x132   : > { %v1067_v56 = vadd.f32 %v883_v50, %v654_v49 }
 0x133   : > { %v1325_v59 = vld.sshfl [vmem:[#allocation1 + $0x20] sm:$0xff pattern:$0x73625140] }
 0x134   : > { %1430 = vst.msk [vmem:[%s1796_s7 + $0xa8] sm:$0xff] %vm1408_vm2, %v1325_v59  ;;  %v1061_v59 = vadd.f32 %v877_v22, %v515_v34 }
 0x135   : > { %1330 = vst [vmem:[#allocation1 + $0x20] ss:$4 sm:$0xff] %v1045_v60  ;;  %v884_v60 = vperm.slane %v820_v52, 0 }
 0x136   : > { %1331 = vst [vmem:[#allocation1 + $0x21] ss:$4 sm:$0xff] %v1046_v57  ;;  %v652_v57 = vrot.slane %v515_v34, 6 }
 0x137   : > { %v1334_v5 = vld.sshfl [vmem:[#allocation1] sm:$0xff pattern:$0x73625140]  ;;  %1332 = vst [vmem:[#allocation1 + $0x22] ss:$4 sm:$0xff] %v1047_v61  ;;  %v1062_v61 = vadd.f32 %v878_v25, %v650_v54  ;;  %v1068_v1 = vadd.f32 %v884_v60, %v655_v58 }
 0x138   : > { %1336 = vst [vmem:[#allocation1] ss:$4 sm:$0xff] %v1049_v3  ;;  %v1064_v63 = vadd.f32 %v880_v31, %v652_v57  ;;  %v521_v3 = vadd.f32 %v1969_v44, %v520_v48 }
 0x139   : > { %1337 = vst [vmem:[#allocation1 + $0x1] ss:$4 sm:$0xff] %v1050_v4  ;;  %v822_v4 = vrot.slane %v1960_v30, 5  ;;  %v526_v22 = vpop.f32.mrf.mxu3 }
 0x13a   : > { %1338 = vst [vmem:[#allocation1 + $0x2] ss:$4 sm:$0xff] %v1051_v7  ;;  %v524_v7 = vadd.f32 %v1969_v44, %v523_v0  ;;  %v657_v12 = vrot.slane %v521_v3, 4  ;;  %v658_v15 = vrot.slane %v521_v3, 6  ;;  %v527_v24 = vadd.f32 %v1969_v44, %v526_v22 }
 0x13b   : > { %1339 = vst [vmem:[#allocation1 + $0x3] ss:$4 sm:$0xff] %v1052_v8  ;;  %v885_v8 = vperm.slane %v821_v2, 0  ;;  %v886_v10 = vperm.slane %v822_v4, 0 }
 0x13c   : > { %1431 = vst.msk [vmem:[%s1796_s7 + $0xb0] sm:$0xff] %vm1408_vm2, %v1334_v5  ;;  %v823_v5 = vrot.slane %v1960_v30, 6  ;;  %v659_v17 = vrot.slane %v524_v7, 2  ;;  %v660_v21 = vrot.slane %v524_v7, 4  ;;  %v1072_v25 = vadd.f32 %v888_v16, %v658_v15 }
 0x13d   : > { %1333 = vst [vmem:[#allocation1 + $0x23] ss:$4 sm:$0xff] %v1048_v9  ;;  %v656_v9 = vrot.slane %v521_v3, 2  ;;  %v1069_v20 = vadd.f32 %v885_v8, %v521_v3  ;;  %v1073_v27 = vadd.f32 %v881_v43, %v524_v7  ;;  %v662_v31 = vrot.slane %v527_v24, 2 }
 0x13e   : > { %v887_v13 = vperm.slane %v823_v5, 0  ;;  %v1075_v28 = vadd.f32 %v883_v50, %v660_v21  ;;  %v1077_v37 = vadd.f32 %v885_v8, %v527_v24 }
 0x140   : > { %v1071_v11 = vadd.f32 %v887_v13, %v657_v12 }
 0x142   : > { %v1344_v23 = vld.sshfl [vmem:[#allocation1] sm:$0xff pattern:$0x73625140] }
 0x143   : > { %1433 = vst.msk [vmem:[%s1796_s7 + $0xc0] sm:$0xff] %vm1408_vm2, %v1344_v23  ;;  %v1070_v23 = vadd.f32 %v886_v10, %v656_v9 }
 0x144   : > { %1346 = vst [vmem:[#allocation1] ss:$4 sm:$0xff] %v1057_v18  ;;  %v1335_v33 = vld.sshfl [vmem:[#allocation1 + $0x20] sm:$0xff pattern:$0x73625140]  ;;  %v661_v18 = vrot.slane %v524_v7, 6 }
 0x145   : > { %1347 = vst [vmem:[#allocation1 + $0x1] ss:$4 sm:$0xff] %v1058_v26  ;;  %v1074_v26 = vadd.f32 %v882_v47, %v659_v17 }
 0x146   : > { %1348 = vst [vmem:[#allocation1 + $0x2] ss:$4 sm:$0xff] %v1059_v29  ;;  %v1076_v29 = vadd.f32 %v884_v60, %v661_v18 }
 0x147   : > { %1349 = vst [vmem:[#allocation1 + $0x3] ss:$4 sm:$0xff] %v1060_v32  ;;  %v663_v32 = vrot.slane %v527_v24, 4 }
 0x148   : > { %1340 = vst [vmem:[#allocation1 + $0x20] ss:$4 sm:$0xff] %v1053_v35  ;;  %v1078_v35 = vadd.f32 %v886_v10, %v662_v31 }
 0x149   : > { %1341 = vst [vmem:[#allocation1 + $0x21] ss:$4 sm:$0xff] %v1054_v36  ;;  %v1079_v39 = vadd.f32 %v887_v13, %v663_v32 }
 0x14a   : > { %1342 = vst [vmem:[#allocation1 + $0x22] ss:$4 sm:$0xff] %v1055_v40 }
 0x14b   : > { %1343 = vst [vmem:[#allocation1 + $0x23] ss:$4 sm:$0xff] %v1056_v41 }
 0x14c   : > { %1432 = vst.msk [vmem:[%s1796_s7 + $0xb8] sm:$0xff] %vm1408_vm2, %v1335_v33  ;;  %v664_v33 = vrot.slane %v527_v24, 6 }
 0x14e   : > { %v1354_v51 = vld.sshfl [vmem:[#allocation1] sm:$0xff pattern:$0x73625140]  ;;  %v1080_v30 = vadd.f32 %v888_v16, %v664_v33 }
 0x14f   : > { %1435 = vst.msk [vmem:[%s1796_s7 + $0xd0] sm:$0xff] %vm1408_vm2, %v1354_v51 }
 0x150   : > { %1356 = vst [vmem:[#allocation1] ss:$4 sm:$0xff] %v1065_v53 }
 0x151   : > { %1357 = vst [vmem:[#allocation1 + $0x1] ss:$4 sm:$0xff] %v1066_v55 }
 0x152   : > { %v1345_v42 = vld.sshfl [vmem:[#allocation1 + $0x20] sm:$0xff pattern:$0x73625140]  ;;  %1358 = vst [vmem:[#allocation1 + $0x2] ss:$4 sm:$0xff] %v1067_v56 }
 0x153   : > { %1434 = vst.msk [vmem:[%s1796_s7 + $0xc8] sm:$0xff] %vm1408_vm2, %v1345_v42 }
 0x154   : > { %1350 = vst [vmem:[#allocation1 + $0x20] ss:$4 sm:$0xff] %v1061_v59 }
 0x155   : > { %1351 = vst [vmem:[#allocation1 + $0x21] ss:$4 sm:$0xff] %v1062_v61 }
 0x156   : > { %1352 = vst [vmem:[#allocation1 + $0x22] ss:$4 sm:$0xff] %v1063_v62 }
 0x157   : > { %1353 = vst [vmem:[#allocation1 + $0x23] ss:$4 sm:$0xff] %v1064_v63 }
 0x158   : > { %1359 = vst [vmem:[#allocation1 + $0x3] ss:$4 sm:$0xff] %v1068_v1 }
 0x15e   : > { %v1355_v14 = vld.sshfl [vmem:[#allocation1 + $0x20] sm:$0xff pattern:$0x73625140] }
 0x15f   : > { %1436 = vst.msk [vmem:[%s1796_s7 + $0xd8] sm:$0xff] %vm1408_vm2, %v1355_v14  ;;  %v1364_v19 = vld.sshfl [vmem:[#allocation1] sm:$0xff pattern:$0x73625140] }
 0x160   : > { %1437 = vst.msk [vmem:[%s1796_s7 + $0xe0] sm:$0xff] %vm1408_vm2, %v1364_v19 }
 0x161   : > { %1360 = vst [vmem:[#allocation1 + $0x20] ss:$4 sm:$0xff] %v1069_v20 }
 0x162   : > { %1361 = vst [vmem:[#allocation1 + $0x21] ss:$4 sm:$0xff] %v1070_v23 }
 0x163   : > { %1362 = vst [vmem:[#allocation1 + $0x22] ss:$4 sm:$0xff] %v1071_v11 }
 0x164   : > { %1363 = vst [vmem:[#allocation1 + $0x23] ss:$4 sm:$0xff] %v1072_v25 }
 0x165   : > { %1366 = vst [vmem:[#allocation1] ss:$4 sm:$0xff] %v1073_v27 }
 0x166   : > { %1367 = vst [vmem:[#allocation1 + $0x1] ss:$4 sm:$0xff] %v1074_v26 }
 0x167   : > { %1368 = vst [vmem:[#allocation1 + $0x2] ss:$4 sm:$0xff] %v1075_v28 }
 0x168   : > { %1369 = vst [vmem:[#allocation1 + $0x3] ss:$4 sm:$0xff] %v1076_v29 }
 0x16b   : > { %v1365_v36 = vld.sshfl [vmem:[#allocation1 + $0x20] sm:$0xff pattern:$0x73625140] }
 0x16c   : > { %1438 = vst.msk [vmem:[%s1796_s7 + $0xe8] sm:$0xff] %vm1408_vm2, %v1365_v36 }
 0x16d   : > { %1370 = vst [vmem:[#allocation1 + $0x20] ss:$4 sm:$0xff] %v1077_v37 }
 0x16e   : > { %1371 = vst [vmem:[#allocation1 + $0x21] ss:$4 sm:$0xff] %v1078_v35 }
 0x16f   : > { %v1374_v40 = vld.sshfl [vmem:[#allocation1] sm:$0xff pattern:$0x73625140]  ;;  %1372 = vst [vmem:[#allocation1 + $0x22] ss:$4 sm:$0xff] %v1079_v39 }
 0x170   : > { %1439 = vst.msk [vmem:[%s1796_s7 + $0xf0] sm:$0xff] %vm1408_vm2, %v1374_v40 }
 0x171   : > { %1373 = vst [vmem:[#allocation1 + $0x23] ss:$4 sm:$0xff] %v1080_v30 }
 0x178   : > { %v1375_v38 = vld.sshfl [vmem:[#allocation1 + $0x20] sm:$0xff pattern:$0x73625140] }
 0x179   : > { %1440 = vst.msk [vmem:[%s1796_s7 + $0xf8] sm:$0xff] %vm1408_vm2, %v1375_v38 }
 0x17a PF: > { %s14_s17 = sadd.s32 1, %s1655_s17   ;;  %s2014_s15 = smov %s1651_s16 }
 0x17b   : > { %p11_p5 = scmp.ge.s32.totalorder %s14_s17, 4   ;;  %s2015_s16 = smov %s2017_s18 }
 0x17d   :  { %13 = sbr.rel (!%p11_p5) target bundleno = 2 (0x2), region = 76 }

</bundles_post_ra>
